<compile_context>
chip_gen: v7x
topology: tpu7x:2x2x1
jax: 0.10.0
libtpu: 0.0.40
codegen_flags: <defaults>
</compile_context>

<pallas_src>
import jax
import jax.numpy as jnp
from jax.experimental import pallas as pl
from jax.experimental.pallas import tpu as pltpu

PAD = 128          # padded feature width of the packed weights / biases
NUM_LAYERS = 4
TB_MAX = 2048      # max batch-tile rows (multiple of 8); well under VMEM limits


def _round_up(n, m):
    return ((n + m - 1) // m) * m


def _cdiv(a, b):
    return -(-a // b)


def dqn_kernel(x_ref, w_ref, b_ref, out_ref):
    """One batch tile: 4 fused (matmul + bias + ReLU) layers.

    x_ref:   [TB, n_obs]       f32   (true feature width, no lane padding)
    w_ref:   [4, 128, 128]     f32/bf16 (zero-padded weights, VMEM-resident)
    b_ref:   [4, 1, 128]       f32   (zero-padded biases,  VMEM-resident)
    out_ref: [TB, n_actions]   f32   (true action width, single masked store)
    """
    n_obs = x_ref.shape[-1]
    n_act = out_ref.shape[-1]
    cdt = w_ref.dtype                       # MXU operand dtype (bf16 or f32)
    prec = jax.lax.Precision.HIGHEST if cdt == jnp.float32 else None

    x = x_ref[...].astype(cdt)

    # layer1 + ReLU (contract only the real n_obs rows of the padded weight)
    h = jnp.dot(x, w_ref[0, :n_obs, :],
                preferred_element_type=jnp.float32, precision=prec) + b_ref[0]
    h = jnp.maximum(h, 0.0)

    # layer2 + ReLU
    h = jnp.dot(h.astype(cdt), w_ref[1],
                preferred_element_type=jnp.float32, precision=prec) + b_ref[1]
    h = jnp.maximum(h, 0.0)

    # layer3 + ReLU
    h = jnp.dot(h.astype(cdt), w_ref[2],
                preferred_element_type=jnp.float32, precision=prec) + b_ref[2]
    h = jnp.maximum(h, 0.0)

    # layer4 (no activation) -- produce only the real n_actions columns
    out = jnp.dot(h.astype(cdt), w_ref[3, :, :n_act],
                  preferred_element_type=jnp.float32,
                  precision=prec) + b_ref[3, :, :n_act]
    out_ref[...] = out.astype(out_ref.dtype)


def pack_params(params, compute_dtype=jnp.bfloat16):
    """Pack per-layer (W, b) into two contiguous zero-padded buffers.

    Returns:
      w_packed: [4, 128, 128] compute_dtype (padding rows/cols are exactly 0).
      b_packed: [4, 1, 128]  float32.
    """
    ws, bs = [], []
    for i in range(1, NUM_LAYERS + 1):
        w = params[f"w{i}"]   # [fan_in, fan_out]
        b = params[f"b{i}"]   # [1, fan_out]
        ws.append(jnp.pad(w, ((0, PAD - w.shape[0]), (0, PAD - w.shape[1]))))
        bs.append(jnp.pad(b, ((0, 0), (0, PAD - b.shape[1]))))
    w_packed = jnp.stack(ws).astype(compute_dtype)   # [4, 128, 128]
    b_packed = jnp.stack(bs).astype(jnp.float32)     # [4, 1, 128]
    return w_packed, b_packed


def _choose_tiling(B):
    """Adaptive batch tile: big tiles, minimal pad waste, >=2 tiles for v7x."""
    n_tiles = max(_cdiv(B, TB_MAX), 2 if B >= 1024 else 1)
    TB = _round_up(_cdiv(B, n_tiles), 8)     # multiple of 8 sublanes
    return TB, TB * n_tiles, n_tiles


def dqn_forward(x, w_packed, b_packed, n_actions):
    """x: [B, n_observations] float32 -> [B, n_actions] float32."""
    B, n_obs = x.shape
    assert n_obs <= PAD and n_actions <= PAD, "feature dims must fit in 128"

    TB, B_pad, n_tiles = _choose_tiling(B)
    # Only batch rows are padded; feature width stays at n_obs (no lane pad,
    # no wrapper-side dtype cast -> no extra HBM materialization).
    x_p = x if B_pad == B else jnp.pad(x, ((0, B_pad - B), (0, 0)))

    out_padded = pl.pallas_call(
        dqn_kernel,
        out_shape=jax.ShapeDtypeStruct((B_pad, n_actions), jnp.float32),
        grid=(n_tiles,),
        in_specs=[
            pl.BlockSpec((TB, n_obs), lambda i: (i, 0)),              # x tile
            pl.BlockSpec((NUM_LAYERS, PAD, PAD), lambda i: (0, 0, 0)),  # weights
            pl.BlockSpec((NUM_LAYERS, 1, PAD), lambda i: (0, 0, 0)),    # biases
        ],
        out_specs=pl.BlockSpec((TB, n_actions), lambda i: (i, 0)),
        compiler_params=pltpu.CompilerParams(
            dimension_semantics=("parallel",)),      # megacore split on v7x
    )(x_p, w_packed, b_packed)

    return out_padded[:B]


def init_params(key, n_observations, n_actions, hidden=32):
    """Deterministic init mimicking nn.Linear default (uniform +- 1/sqrt(fan_in))."""
    dims = [(n_observations, hidden), (hidden, hidden), (hidden, hidden),
            (hidden, n_actions)]
    params = {}
    for i, (fan_in, fan_out) in enumerate(dims, start=1):
        key, kw, kb = jax.random.split(key, 3)
        bound = 1.0 / jnp.sqrt(jnp.float32(fan_in))
        params[f"w{i}"] = jax.random.uniform(
            kw, (fan_in, fan_out), jnp.float32, minval=-bound, maxval=bound)
        params[f"b{i}"] = jax.random.uniform(
            kb, (1, fan_out), jnp.float32, minval=-bound, maxval=bound)
    return params


def dqn_ref(x, params):
    """Pure-JAX reference (highest precision) for correctness checking."""
    p = jax.lax.Precision.HIGHEST
    h = jnp.maximum(jnp.dot(x, params["w1"], precision=p) + params["b1"], 0.0)
    h = jnp.maximum(jnp.dot(h, params["w2"], precision=p) + params["b2"], 0.0)
    h = jnp.maximum(jnp.dot(h, params["w3"], precision=p) + params["b3"], 0.0)
    return jnp.dot(h, params["w4"], precision=p) + params["b4"]


if __name__ == "__main__":
    n_observations = 8
    n_actions = 4

    key = jax.random.PRNGKey(0)
    key, kx_small, kx_big = jax.random.split(key, 3)
    params = init_params(key, n_observations, n_actions, hidden=32)

    # --- small batch, f32 MXU operands (tight-tolerance path) ---------------
    x_small = jax.random.normal(kx_small, (2, n_observations), jnp.float32)
    w_f32, b_f32 = pack_params(params, compute_dtype=jnp.float32)
    out_small = jax.block_until_ready(
        dqn_forward(x_small, w_f32, b_f32, n_actions))
    ref_small = dqn_ref(x_small, params)
    assert out_small.shape == (2, n_actions)
    assert jnp.allclose(out_small, ref_small, atol=2e-3, rtol=2e-3), \
        "f32 path mismatch vs reference"

    # --- larger batch, default bf16 MXU operands, multi-tile grid -----------
    x_big = jax.random.normal(kx_big, (1200, n_observations), jnp.float32)
    w_bf16, b_bf16 = pack_params(params)            # bf16 default
    out_big = jax.block_until_ready(
        dqn_forward(x_big, w_bf16, b_bf16, n_actions))
    ref_big = dqn_ref(x_big, params)
    assert out_big.shape == (1200, n_actions)
    assert jnp.allclose(out_big, ref_big, atol=5e-2, rtol=5e-2), \
        "bf16 path mismatch vs reference"

    print("KERNEL_OK")
</pallas_src>

<mosaic_0001>
module attributes {stable_mosaic.version = 11 : i64} {
  func.func @dqn_kernel(%arg0: i32, %arg1: memref<8x8xf32, #tpu.memory_space<vmem>>, %arg2: memref<4x128x128xf32, #tpu.memory_space<vmem>>, %arg3: memref<4x1x128xf32, #tpu.memory_space<vmem>>, %arg4: memref<8x4xf32, #tpu.memory_space<vmem>>) attributes {dimension_semantics = [#tpu.dimension_semantics<parallel>], iteration_bounds = array<i64: 1>, scalar_prefetch = 0 : i64, scratch_operands = 0 : i64, tpu.core_type = #tpu.core_type<tc>, window_params = [{transform_indices = @transform_0, window_bounds = array<i64: 8, 8>}, {pipeline_mode = #tpu.pipeline_mode<synchronous>, transform_indices = @transform_1, window_bounds = array<i64: 4, 128, 128>}, {pipeline_mode = #tpu.pipeline_mode<synchronous>, transform_indices = @transform_2, window_bounds = array<i64: 4, 1, 128>}, {transform_indices = @transform_3, window_bounds = array<i64: 8, 4>}]} {
    %c0 = arith.constant 0 : index
    %c0_0 = arith.constant 0 : index
    %0 = vector.load %arg1[%c0, %c0_0] : memref<8x8xf32, #tpu.memory_space<vmem>>, vector<8x8xf32>
    %c0_1 = arith.constant 0 : index
    %c0_2 = arith.constant 0 : index
    %c0_3 = arith.constant 0 : index
    %1 = vector.load %arg2[%c0_1, %c0_2, %c0_3] : memref<4x128x128xf32, #tpu.memory_space<vmem>>, vector<1x8x128xf32>
    %2 = vector.shape_cast %1 : vector<1x8x128xf32> to vector<8x128xf32>
    %cst = arith.constant dense<0.000000e+00> : vector<8x128xf32>
    %3 = tpu.matmul %0, %2, %cst {dimension_numbers = #tpu.dot_dimension_numbers<[1], [0], [0], [1], [0, 0, 1, 1], [], []>, precision = #tpu.contract_precision<fp32>} : vector<8x8xf32>, vector<8x128xf32>, vector<8x128xf32> -> vector<8x128xf32>
    %c0_4 = arith.constant 0 : index
    %c0_5 = arith.constant 0 : index
    %c0_6 = arith.constant 0 : index
    %4 = vector.load %arg3[%c0_4, %c0_5, %c0_6] : memref<4x1x128xf32, #tpu.memory_space<vmem>>, vector<1x1x128xf32>
    %5 = vector.shape_cast %4 : vector<1x1x128xf32> to vector<1x128xf32>
    %6 = vector.broadcast %5 : vector<1x128xf32> to vector<8x128xf32>
    %7 = arith.addf %3, %6 : vector<8x128xf32>
    %cst_7 = arith.constant 0.000000e+00 : f32
    %8 = vector.broadcast %cst_7 : f32 to vector<8x128xf32>
    %9 = arith.maximumf %7, %8 : vector<8x128xf32>
    %c1 = arith.constant 1 : index
    %c0_8 = arith.constant 0 : index
    %c0_9 = arith.constant 0 : index
    %10 = vector.load %arg2[%c1, %c0_8, %c0_9] : memref<4x128x128xf32, #tpu.memory_space<vmem>>, vector<1x128x128xf32>
    %11 = vector.shape_cast %10 : vector<1x128x128xf32> to vector<128x128xf32>
    %cst_10 = arith.constant dense<0.000000e+00> : vector<8x128xf32>
    %12 = tpu.matmul %9, %11, %cst_10 {dimension_numbers = #tpu.dot_dimension_numbers<[1], [0], [0], [1], [0, 0, 1, 1], [], []>, precision = #tpu.contract_precision<fp32>} : vector<8x128xf32>, vector<128x128xf32>, vector<8x128xf32> -> vector<8x128xf32>
    %c1_11 = arith.constant 1 : index
    %c0_12 = arith.constant 0 : index
    %c0_13 = arith.constant 0 : index
    %13 = vector.load %arg3[%c1_11, %c0_12, %c0_13] : memref<4x1x128xf32, #tpu.memory_space<vmem>>, vector<1x1x128xf32>
    %14 = vector.shape_cast %13 : vector<1x1x128xf32> to vector<1x128xf32>
    %15 = vector.broadcast %14 : vector<1x128xf32> to vector<8x128xf32>
    %16 = arith.addf %12, %15 : vector<8x128xf32>
    %cst_14 = arith.constant 0.000000e+00 : f32
    %17 = vector.broadcast %cst_14 : f32 to vector<8x128xf32>
    %18 = arith.maximumf %16, %17 : vector<8x128xf32>
    %c2 = arith.constant 2 : index
    %c0_15 = arith.constant 0 : index
    %c0_16 = arith.constant 0 : index
    %19 = vector.load %arg2[%c2, %c0_15, %c0_16] : memref<4x128x128xf32, #tpu.memory_space<vmem>>, vector<1x128x128xf32>
    %20 = vector.shape_cast %19 : vector<1x128x128xf32> to vector<128x128xf32>
    %cst_17 = arith.constant dense<0.000000e+00> : vector<8x128xf32>
    %21 = tpu.matmul %18, %20, %cst_17 {dimension_numbers = #tpu.dot_dimension_numbers<[1], [0], [0], [1], [0, 0, 1, 1], [], []>, precision = #tpu.contract_precision<fp32>} : vector<8x128xf32>, vector<128x128xf32>, vector<8x128xf32> -> vector<8x128xf32>
    %c2_18 = arith.constant 2 : index
    %c0_19 = arith.constant 0 : index
    %c0_20 = arith.constant 0 : index
    %22 = vector.load %arg3[%c2_18, %c0_19, %c0_20] : memref<4x1x128xf32, #tpu.memory_space<vmem>>, vector<1x1x128xf32>
    %23 = vector.shape_cast %22 : vector<1x1x128xf32> to vector<1x128xf32>
    %24 = vector.broadcast %23 : vector<1x128xf32> to vector<8x128xf32>
    %25 = arith.addf %21, %24 : vector<8x128xf32>
    %cst_21 = arith.constant 0.000000e+00 : f32
    %26 = vector.broadcast %cst_21 : f32 to vector<8x128xf32>
    %27 = arith.maximumf %25, %26 : vector<8x128xf32>
    %c3 = arith.constant 3 : index
    %c0_22 = arith.constant 0 : index
    %c0_23 = arith.constant 0 : index
    %28 = vector.load %arg2[%c3, %c0_22, %c0_23] : memref<4x128x128xf32, #tpu.memory_space<vmem>>, vector<1x128x4xf32>
    %29 = vector.shape_cast %28 : vector<1x128x4xf32> to vector<128x4xf32>
    %cst_24 = arith.constant dense<0.000000e+00> : vector<8x4xf32>
    %30 = tpu.matmul %27, %29, %cst_24 {dimension_numbers = #tpu.dot_dimension_numbers<[1], [0], [0], [1], [0, 0, 1, 1], [], []>, precision = #tpu.contract_precision<fp32>} : vector<8x128xf32>, vector<128x4xf32>, vector<8x4xf32> -> vector<8x4xf32>
    %c3_25 = arith.constant 3 : index
    %c0_26 = arith.constant 0 : index
    %c0_27 = arith.constant 0 : index
    %31 = vector.load %arg3[%c3_25, %c0_26, %c0_27] : memref<4x1x128xf32, #tpu.memory_space<vmem>>, vector<1x1x4xf32>
    %32 = vector.shape_cast %31 : vector<1x1x4xf32> to vector<1x4xf32>
    %33 = vector.broadcast %32 : vector<1x4xf32> to vector<8x4xf32>
    %34 = arith.addf %30, %33 : vector<8x4xf32>
    %c0_28 = arith.constant 0 : index
    %c0_29 = arith.constant 0 : index
    %35 = vector.load %arg4[%c0_28, %c0_29] : memref<8x4xf32, #tpu.memory_space<vmem>>, vector<8x4xf32>
    tpu.vector_store %arg4[%c0_28, %c0_29], %34 {strides = array<i32>} : memref<8x4xf32, #tpu.memory_space<vmem>>, vector<8x4xf32>,
    return
  }
  func.func @transform_0(%arg0: i32) -> (i32, i32) {
    %c0_i32 = arith.constant 0 : i32
    %c0_i32_0 = arith.constant 0 : i32
    return %arg0, %c0_i32 : i32, i32
  }
  func.func @transform_1(%arg0: i32) -> (i32, i32, i32) {
    %c0_i32 = arith.constant 0 : i32
    %c0_i32_0 = arith.constant 0 : i32
    %c0_i32_1 = arith.constant 0 : i32
    %c0_i32_2 = arith.constant 0 : i32
    return %c0_i32, %c0_i32_0, %c0_i32_1 : i32, i32, i32
  }
  func.func @transform_2(%arg0: i32) -> (i32, i32, i32) {
    %c0_i32 = arith.constant 0 : i32
    %c0_i32_0 = arith.constant 0 : i32
    %c0_i32_1 = arith.constant 0 : i32
    %c0_i32_2 = arith.constant 0 : i32
    return %c0_i32, %c0_i32_0, %c0_i32_1 : i32, i32, i32
  }
  func.func @transform_3(%arg0: i32) -> (i32, i32) {
    %c0_i32 = arith.constant 0 : i32
    %c0_i32_0 = arith.constant 0 : i32
    return %arg0, %c0_i32 : i32, i32
  }
}

</mosaic_0001>

<bundles_post_ra>
// kernel: tpu_custom_call.1
= control target key start
LH: loop header
LB: loop body
LE: loop exit
PB: predicated region body
PF: predicated region fallthrough
CT: control target
= control target key end

     0   :  { %8 = vsyncpa [#allocation3], 0  ;;  %s4963_s0 = inlined_call_operand.hbm [shape: f32[8,8], index: 0, kind: input, shape index: {}]   ;;  %s4964_s1 = inlined_call_operand.hbm [shape: f32[4,128,128], index: 1, kind: input, shape index: {}]   ;;  %s4965_s2 = inlined_call_operand.vmem [shape: f32[4,1,128], index: 2, kind: input, shape index: {}]   ;;  %s4966_s3 = inlined_call_operand.vmem [shape: f32[8,4], index: 3, kind: output, shape index: {}]  }
   0x1   :  { %9 = vsyncpa [#allocation5], 0  ;;  %s4022_s12 = smov [#allocation2]   ;;  %s4023_s14 = smov [#allocation4]  }
   0x2   :  { %s16_s13 = sshll.u32 %s4022_s12, 4  ;;  %s25_s15 = sshll.u32 %s4023_s14, 4  ;;  %s17_s13 = int_to_ptr.vmem [resolvable:$true] %s16_s13  ;;  %s4049_s15 = int_to_ptr.vmem [resolvable:$true] %s25_s15 }
   0x3   :  { %s3974_s18 = scalar_lea.hbm %s4963_s0, 128 }
   0x4   :  { %p3975_p0 = scmp.ne.s32.totalorder %s4963_s0, %s3974_s18  ;;  %p3978_p1 = scmp.lt.u32.totalorder %s3974_s18, %s4963_s0 }
   0x6   :  { %p3980_p2 = pnand %p3978_p1, %p3975_p0 }
   0x8   :  { %3983 = shalt.err (!%p3980_p2)
}
   0x9   :  { %s3984_s23 = scalar_lea.vmem %s17_s13, 128  ;;  %p3989_p4 = scmp.lt.s32.totalorder %s17_s13, %s17_s13 }
   0xa   :  { %p3985_p3 = scmp.ne.s32.totalorder %s17_s13, %s3984_s23  ;;  %p3990_p5 = scmp.lt.s32.totalorder %s3984_s23, %s3984_s23 }
   0xc   :  { %p3991_p6 = por %p3990_p5, %p3989_p4 }
   0xe   :  { %p3992_p7 = pnand %p3991_p6, %p3985_p3 }
  0x10   :  { %3995 = shalt.err (!%p3992_p7)
}
  0x11   :  { %19 = dma.hbm_to_vmem [thread:$0]  %s4963_s0, 128, %s17_s13, [#allocation3]  }
  0x12   :  { %s3996_s28 = scalar_lea.hbm %s4964_s1, 8192 }
  0x13   :  { %p3997_p8 = scmp.ne.s32.totalorder %s4964_s1, %s3996_s28  ;;  %p4000_p9 = scmp.lt.u32.totalorder %s3996_s28, %s4964_s1 }
  0x15   :  { %p4002_p10 = pnand %p4000_p9, %p3997_p8 }
  0x17   :  { %4005 = shalt.err (!%p4002_p10)
}
  0x18   :  { %s4006_s6 = scalar_lea.vmem %s4049_s15, 8192  ;;  %p4011_p12 = scmp.lt.s32.totalorder %s4049_s15, %s4049_s15 }
  0x19   :  { %p4007_p11 = scmp.ne.s32.totalorder %s4049_s15, %s4006_s6  ;;  %p4012_p13 = scmp.lt.s32.totalorder %s4006_s6, %s4006_s6 }
  0x1b   :  { %p4013_p0 = por %p4012_p13, %p4011_p12 }
  0x1d   :  { %p4014_p1 = pnand %p4013_p0, %p4007_p11 }
  0x1f   :  { %4017 = shalt.err (!%p4014_p1)
}
  0x20   :  { %s4024_s0 = smov 128   ;;  %s4025_s7 = smov 8  }
  0x21   :  { %31 = dma.hbm_to_vmem [thread:$0]  %s4964_s1, 8192, %s4049_s15, [#allocation5], %s4024_s0, %s4024_s0, %s4025_s7  }
  0x22   :  { %4018 = dma.done.wait [#allocation3], 128  }
  0x23   :  { %4019 = vsyncadd [#allocation3], 4294967168 }
  0x24   :  { %4020 = dma.done.wait [#allocation5], 8192  }
  0x25   :  { %4021 = vsyncadd [#allocation5], 4294959104  ;;  %v4974_v0 = vmov 0.0   ;;  %vm4027_vm0 = vmmov 0   ;;  %vm49_vm1 = vcmask 64512   ;;  %v41_v1 = vld [vmem:[#allocation4] sm:$0xff] }
  0x26   :  { %2848 = vmatprep.subr.mxu0 %v4974_v0  ;;  %2850 = vmatprep.mubr.msk.f32.mxu0 %vm4027_vm0, %v4974_v0  ;;  %v40_v2 = vld [vmem:[#allocation2] sm:$0xff]  ;;  %v501_v3 = vld [vmem:[#allocation4 + $0x80] sm:$0xff]  ;;  %v54_v4 = vand.u32 4294901760, %v41_v1  ;;  %v502_v6 = vld [vmem:[#allocation4 + $0x88] sm:$0xff]  ;;  %v4971_v38 = vmov 0.0|0.0   ;;  %vm2500_vm2 = vcmask 31744  }
  0x27   :  { %2833 = vmatprep.subr.mxu1 %v4974_v0  ;;  %2835 = vmatprep.mubr.msk.f32.mxu1 %vm4027_vm0, %v4974_v0  ;;  %v51_v5 = vsel %vm49_vm1, %v40_v2, 0  ;;  %v526_v7 = vand.u32 4294901760, %v501_v3  ;;  %v503_v8 = vld [vmem:[#allocation4 + $0x90] sm:$0xff]  ;;  %v504_v9 = vld [vmem:[#allocation4 + $0x98] sm:$0xff]  ;;  %v529_v11 = vand.u32 4294901760, %v502_v6  ;;  %v505_v12 = vld [vmem:[#allocation4 + $0xa0] sm:$0xff] }
  0x28   :  { %v119_v10 = vand.u32 4294901760, %v51_v5  ;;  %v506_v13 = vld [vmem:[#allocation4 + $0xa8] sm:$0xff]  ;;  %v131_v14 = vsub.f32 %v41_v1, %v54_v4  ;;  %2849 = vmatpush3.msra.mxu0 %v54_v4  ;;  %2834 = vmatpush3.msra.mxu1 %v54_v4  ;;  %v532_v16 = vand.u32 4294901760, %v503_v8  ;;  %v535_v17 = vand.u32 4294901760, %v504_v9  ;;  %v507_v18 = vld [vmem:[#allocation4 + $0xb0] sm:$0xff]  ;;  %v508_v23 = vld [vmem:[#allocation4 + $0xb8] sm:$0xff] }
  0x29   :  { %v4086_v15 = vsub.f32 %v501_v3, %v526_v7  ;;  %2838 = vmatprep.subr.mxu1 %v4974_v0  ;;  %2853 = vmatprep.subr.mxu0 %v4974_v0  ;;  %v4090_v20 = vsub.f32 %v502_v6, %v529_v11  ;;  %v538_v21 = vand.u32 4294901760, %v505_v12  ;;  %v541_v22 = vand.u32 4294901760, %v506_v13  ;;  %v509_v43 = vld [vmem:[#allocation4 + $0xc0] sm:$0xff]  ;;  %v510_v44 = vld [vmem:[#allocation4 + $0xc8] sm:$0xff]  ;;  %v511_v48 = vld [vmem:[#allocation4 + $0xd0] sm:$0xff] }
  0x2a   :  { %v120_v19 = vsub.f32 %v51_v5, %v119_v10  ;;  %v132_v24 = vand.u32 4294901760, %v131_v14  ;;  %v4092_v25 = vsub.f32 %v503_v8, %v532_v16  ;;  %v4094_v26 = vsub.f32 %v504_v9, %v535_v17  ;;  %v512_v49 = vld [vmem:[#allocation4 + $0xd8] sm:$0xff]  ;;  %v513_v55 = vld [vmem:[#allocation4 + $0xe0] sm:$0xff]  ;;  %v514_v56 = vld [vmem:[#allocation4 + $0xe8] sm:$0xff] }
  0x2b   :  { %v544_v27 = vand.u32 4294901760, %v507_v18  ;;  %v4096_v29 = vsub.f32 %v505_v12, %v538_v21  ;;  %v4098_v30 = vsub.f32 %v506_v13, %v541_v22  ;;  %v547_v32 = vand.u32 4294901760, %v508_v23  ;;  %v515_v60 = vld [vmem:[#allocation4 + $0xf0] sm:$0xff]  ;;  %v516_v61 = vld [vmem:[#allocation4 + $0xf8] sm:$0xff] }
  0x2c   :  { %v121_v28 = vand.u32 4294901760, %v120_v19  ;;  %v133_v31 = vsub.f32 %v131_v14, %v132_v24  ;;  %v4116_v39 = vpack.c.bf16 %v529_v11, %v526_v7  ;;  %v4122_v40 = vpack.c.bf16 %v535_v17, %v532_v16 }
  0x2d   :  { %v4100_v33 = vsub.f32 %v507_v18, %v544_v27  ;;  %v4104_v36 = vsub.f32 %v508_v23, %v547_v32  ;;  %v4128_v41 = vpack.c.bf16 %v541_v22, %v538_v21  ;;  %v4136_v42 = vpack.c.bf16 %v547_v32, %v544_v27 }
  0x2e   :  { %2851 = vmatmul.mubr.f32.vlgmr.msra.gmra.mrb[0].mxu0 %v121_v28  ;;  %v122_v34 = vsub.f32 %v120_v19, %v121_v28  ;;  %v134_v35 = vand.u32 4294901760, %v133_v31  ;;  %v550_v45 = vand.u32 4294901760, %v509_v43  ;;  %v553_v46 = vand.u32 4294901760, %v510_v44 }
  0x2f   :  { %2854 = vmatpush3.msra.mxu0 %v132_v24  ;;  %2855 = vmatprep.mubr.msk.f32.mxu0 %vm4027_vm0, %v4974_v0  ;;  %v556_v52 = vand.u32 4294901760, %v511_v48  ;;  %v559_v53 = vand.u32 4294901760, %v512_v49  ;;  %v562_v57 = vand.u32 4294901760, %v513_v55  ;;  %v565_v58 = vand.u32 4294901760, %v514_v56 }
  0x30   :  { %v123_v37 = vand.u32 4294901760, %v122_v34  ;;  %2858 = vmatprep.subr.mxu0 %v4974_v0  ;;  %v4144_v47 = vpack.c.bf16 %v553_v46, %v550_v45  ;;  %v4146_v50 = vsub.f32 %v509_v43, %v550_v45  ;;  %v4148_v51 = vsub.f32 %v510_v44, %v553_v46 }
  0x31   :  { %v4154_v54 = vpack.c.bf16 %v559_v53, %v556_v52  ;;  %v4160_v59 = vpack.c.bf16 %v565_v58, %v562_v57  ;;  %v568_v62 = vand.u32 4294901760, %v515_v60  ;;  %v571_v63 = vand.u32 4294901760, %v516_v61 }
  0x32   :  { %2836 = vmatmul.mubr.f32.vlgmr.msra.gmra.mrb[0].mxu1 %v123_v37  ;;  %v4168_v2 = vsub.f32 %v511_v48, %v556_v52  ;;  %v4170_v3 = vsub.f32 %v512_v49, %v559_v53  ;;  %v4174_v5 = vsub.f32 %v514_v56, %v565_v58  ;;  %v619_v8 = vand.u32 4294901760, %v4086_v15 }
  0x33   :  { %2839 = vmatpush3.msra.mxu1 %v134_v35  ;;  %2840 = vmatprep.mubr.msk.f32.mxu1 %vm4027_vm0, %v4974_v0  ;;  %v4166_v1 = vpack.c.bf16 %v571_v63, %v568_v62  ;;  %v4177_v6 = vsub.f32 %v515_v60, %v568_v62  ;;  %v4179_v7 = vsub.f32 %v516_v61, %v571_v63  ;;  %v626_v9 = vand.u32 4294901760, %v4090_v20 }
  0x34   :  { %2843 = vmatprep.subr.mxu1 %v4974_v0  ;;  %v620_v11 = vsub.f32 %v4086_v15, %v619_v8  ;;  %v633_v16 = vand.u32 4294901760, %v4092_v25  ;;  %v640_v17 = vand.u32 4294901760, %v4094_v26  ;;  %v647_v27 = vand.u32 4294901760, %v4096_v29 }
  0x35   :  { %v627_v12 = vsub.f32 %v4090_v20, %v626_v9  ;;  %v654_v28 = vand.u32 4294901760, %v4098_v30  ;;  %v661_v44 = vand.u32 4294901760, %v4100_v33  ;;  %v668_v45 = vand.u32 4294901760, %v4104_v36 }
  0x36   :  { %2856 = vmatmul.mubr.f32.vlgmr.msra.gmra.mrb[0].mxu0 %v119_v10  ;;  %v621_v13 = vand.u32 4294901760, %v620_v11  ;;  %v634_v21 = vsub.f32 %v4092_v25, %v633_v16  ;;  %v641_v22 = vsub.f32 %v4094_v26, %v640_v17  ;;  %v648_v34 = vsub.f32 %v4096_v29, %v647_v27 }
  0x37   :  { %2859 = vmatpush3.msra.mxu0 %v54_v4  ;;  %2860 = vmatprep.mubr.msk.f32.mxu0 %vm4027_vm0, %v4974_v0  ;;  %v4172_v4 = vsub.f32 %v513_v55, %v562_v57  ;;  %v4202_v32 = vpack.c.bf16 %v654_v28, %v647_v27  ;;  %v655_v35 = vsub.f32 %v4098_v30, %v654_v28  ;;  %v675_v56 = vand.u32 4294901760, %v4146_v50 }
  0x38   :  { %3493 = vmatprep.subr.bf16.mxu0 %v4971_v38  ;;  %v635_v23 = vand.u32 4294901760, %v634_v21  ;;  %v642_v24 = vand.u32 4294901760, %v641_v22  ;;  %v649_v37 = vand.u32 4294901760, %v648_v34  ;;  %v4210_v48 = vpack.c.bf16 %v668_v45, %v661_v44 }
  0x39   :  { %v656_v43 = vand.u32 4294901760, %v655_v35  ;;  %v662_v49 = vsub.f32 %v4100_v33, %v661_v44  ;;  %v669_v52 = vsub.f32 %v4104_v36, %v668_v45  ;;  %v682_v57 = vand.u32 4294901760, %v4148_v51 }
  0x3a   :  { %2841 = vmatmul.mubr.f32.vlgmr.msra.gmra.mrb[0].mxu1 %v119_v10  ;;  %v4200_v31 = vpack.c.bf16 %v642_v24, %v635_v23  ;;  %v676_v61 = vsub.f32 %v4146_v50, %v675_v56  ;;  %v696_v11 = vand.u32 4294901760, %v4170_v3  ;;  %v703_v22 = vand.u32 4294901760, %v4172_v4 }
  0x3b   :  { %2844 = vmatpush3.msra.mxu1 %v131_v14  ;;  %2845 = vmatprep.mubr.msk.f32.mxu1 %vm4027_vm0, %v4974_v0  ;;  %v628_v14 = vand.u32 4294901760, %v627_v12  ;;  %v4208_v46 = vpack.c.bf16 %v656_v43, %v649_v37  ;;  %v663_v53 = vand.u32 4294901760, %v662_v49  ;;  %v670_v55 = vand.u32 4294901760, %v669_v52 }
  0x3c   :  { %3565 = vmatprep.subr.bf16.mxu1 %v4971_v38  ;;  %v4218_v60 = vpack.c.bf16 %v682_v57, %v675_v56  ;;  %v683_v62 = vsub.f32 %v4148_v51, %v682_v57  ;;  %v677_v63 = vand.u32 4294901760, %v676_v61  ;;  %v710_v23 = vand.u32 4294901760, %v4174_v5 }
  0x3d   :  { %v4192_v18 = vpack.c.bf16 %v628_v14, %v621_v13  ;;  %v4216_v58 = vpack.c.bf16 %v670_v55, %v663_v53  ;;  %v704_v28 = vsub.f32 %v4172_v4, %v703_v22  ;;  %v717_v43 = vand.u32 4294901760, %v4177_v6 }
  0x3e   :  { %2861 = vmatmul.mubr.f32.vlgmr.msra.gmra.mrb[0].mxu0 %v119_v10  ;;  %v4186_v10 = vpack.c.bf16 %v626_v9, %v619_v8  ;;  %v684_v8 = vand.u32 4294901760, %v683_v62  ;;  %v689_v9 = vand.u32 4294901760, %v4168_v2  ;;  %v4234_v27 = vpack.c.bf16 %v710_v23, %v703_v22 }
  0x3f   :  { %3495 = vmatpush3.bf16.msra.mxu0 %v4116_v39  ;;  %2895 = vmatprep.mubr.msk.f32.mxu0 %vm4027_vm0, %v4974_v0  ;;  %v711_v34 = vsub.f32 %v4174_v5, %v710_v23  ;;  %v705_v35 = vand.u32 4294901760, %v704_v28  ;;  %v724_v44 = vand.u32 4294901760, %v4179_v7  ;;  %v718_v52 = vsub.f32 %v4177_v6, %v717_v43  ;;  %v4270_v28 = vld [vmem:[#allocation4 + $0x110] sm:$0xff] }
  0x40   :  { %3496 = vmatprep.subr.bf16.mxu0 %v4971_v38  ;;  %v4224_v12 = vpack.c.bf16 %v684_v8, %v677_v63  ;;  %v4226_v13 = vpack.c.bf16 %v696_v11, %v689_v9  ;;  %v690_v14 = vsub.f32 %v4168_v2, %v689_v9 }
  0x41   :  { %v712_v37 = vand.u32 4294901760, %v711_v34  ;;  %v4242_v49 = vpack.c.bf16 %v724_v44, %v717_v43  ;;  %v725_v53 = vsub.f32 %v4179_v7, %v724_v44  ;;  %v719_v55 = vand.u32 4294901760, %v718_v52  ;;  %v4272_v34 = vld [vmem:[#allocation4 + $0x118] sm:$0xff] }
  0x42   :  { %2846 = vmatmul.mubr.f32.vlgmr.msra.gmra.mrb[0].mxu1 %v120_v19  ;;  %v4194_v19 = vpack.c.bf16 %v640_v17, %v633_v16  ;;  %v697_v16 = vsub.f32 %v4170_v3, %v696_v11  ;;  %v691_v17 = vand.u32 4294901760, %v690_v14  ;;  %v4969_v43 = vand.u32 4294901760, %v4270_v28  ;;  %v2508_v11 = vld [vmem:[%s4965_s2] ss:$0 sm:$0xff] }
  0x43   :  { %3567 = vmatpush3.bf16.msra.mxu1 %v4116_v39  ;;  %3498 = vmatpush3.bf16.msra.mxu0 %v4122_v40  ;;  %v4240_v45 = vpack.c.bf16 %v712_v37, %v705_v35  ;;  %v726_v56 = vand.u32 4294901760, %v725_v53  ;;  %v4970_v44 = vand.u32 4294901760, %v4272_v34 }
  0x44   :  { %3568 = vmatprep.subr.bf16.mxu1 %v4971_v38  ;;  %3499 = vmatprep.subr.bf16.mxu0 %v4971_v38  ;;  %v698_v21 = vand.u32 4294901760, %v697_v16  ;;  %v4289_v52 = vsub.f32 %v4270_v28, %v4969_v43 }
  0x45   :  { %3000 = vmatprep.mubr.msk.f32.mxu1 %vm4027_vm0, %v4974_v0  ;;  %v4246_v57 = vpack.c.bf16 %v726_v56, %v719_v55  ;;  %v4294_v53 = vsub.f32 %v4272_v34, %v4970_v44  ;;  %v4296_v55 = vld [vmem:[#allocation4 + $0x120] sm:$0xff]  ;;  %v4298_v56 = vld [vmem:[#allocation4 + $0x128] sm:$0xff] }
  0x46   :  { %v4232_v24 = vpack.c.bf16 %v698_v21, %v691_v17  ;;  %v4264_v17 = vld [vmem:[#allocation4 + $0x100] sm:$0xff]  ;;  %v4266_v21 = vld [vmem:[#allocation4 + $0x108] sm:$0xff] }
  0x47   :  { %3570 = vmatpush3.bf16.msra.mxu1 %v4122_v40  ;;  %3501 = vmatpush3.bf16.msra.mxu0 %v4128_v41  ;;  %v4968_v22 = vand.u32 4294901760, %v4264_v17  ;;  %v4967_v23 = vand.u32 4294901760, %v4266_v21 }
  0x48   :  { %3571 = vmatprep.subr.bf16.mxu1 %v4971_v38  ;;  %3502 = vmatprep.subr.bf16.mxu0 %v4971_v38 }
  0x49   :  { %v4277_v35 = vsub.f32 %v4264_v17, %v4968_v22  ;;  %v4282_v37 = vsub.f32 %v4266_v21, %v4967_v23  ;;  %v4973_v23 = vand.u32 4294901760, %v4296_v55  ;;  %v4976_v22 = vand.u32 4294901760, %v4298_v56 }
  0x4b   :  { %3573 = vmatpush3.bf16.msra.mxu1 %v4128_v41  ;;  %3504 = vmatpush3.bf16.msra.mxu0 %v4136_v42  ;;  %v4305_v16 = vsub.f32 %v4296_v55, %v4973_v23  ;;  %v4310_v43 = vsub.f32 %v4298_v56, %v4976_v22 }
  0x4c   :  { %3574 = vmatprep.subr.bf16.mxu1 %v4971_v38  ;;  %3505 = vmatprep.subr.bf16.mxu0 %v4971_v38 }
  0x4d   :  { %4994 = vst [vmem:[#allocation8_spill] sm:$0xff] %v4310_v43  ;;  %v4996_v43 = vmov 0.0|0.0  }
  0x4f   :  { %3576 = vmatpush3.bf16.msra.mxu1 %v4136_v42  ;;  %3507 = vmatpush3.bf16.msra.mxu0 %v4144_v47 }
  0x50   :  { %3577 = vmatprep.subr.bf16.mxu1 %v4971_v38  ;;  %3508 = vmatprep.subr.bf16.mxu0 %v4971_v38 }
  0x53   :  { %3579 = vmatpush3.bf16.msra.mxu1 %v4144_v47  ;;  %3510 = vmatpush3.bf16.msra.mxu0 %v4154_v54 }
  0x54   :  { %3580 = vmatprep.subr.bf16.mxu1 %v4971_v38  ;;  %3511 = vmatprep.subr.bf16.mxu0 %v4971_v38 }
  0x57   :  { %3582 = vmatpush3.bf16.msra.mxu1 %v4154_v54  ;;  %3513 = vmatpush3.bf16.msra.mxu0 %v4160_v59 }
  0x58   :  { %3583 = vmatprep.subr.bf16.mxu1 %v4971_v38  ;;  %3514 = vmatprep.subr.bf16.mxu0 %v4971_v38 }
  0x5b   :  { %3585 = vmatpush3.bf16.msra.mxu1 %v4160_v59  ;;  %3516 = vmatpush3.bf16.msra.mxu0 %v4166_v1 }
  0x5c   :  { %3586 = vmatprep.subr.bf16.mxu1 %v4971_v38  ;;  %3517 = vmatprep.subr.bf16.mxu0 %v4971_v38 }
  0x5f   :  { %3588 = vmatpush3.bf16.msra.mxu1 %v4166_v1 }
  0x60   :  { %3589 = vmatprep.subr.bf16.mxu1 %v4971_v38 }
 0x111   :  { %v495_v44 = vpop.f32.mrb[0].mxu0 }
 0x112   :  { %v2862_v14 = vpop.f32.mrb[1].mxu0 }
 0x113   :  { %v4995_v14 = vmov 0.0  }
 0x115   :  { %v275_v9 = vpop.f32.mrb[0].mxu1 }
 0x116   :  { %v3925_v8 = vadd.f32 %v2508_v11, %v275_v9  ;;  %v2847_v63 = vpop.f32.mrb[1].mxu1 }
 0x118   :  { %v3926_v62 = vadd.f32 %v3925_v8, %v495_v44  ;;  %v1293_v8 = vand.u32 4294901760, %v4282_v37 }
 0x11a   :  { %v499_v61 = vmax.f32 %v3926_v62, 0.0  ;;  %v1286_v62 = vand.u32 4294901760, %v4277_v35 }
 0x11c   :  { %v4315_v38 = vand.u32 4294901760, %v499_v61 }
 0x11e   :  { %v4318_v23 = vsub.f32 %v499_v61, %v4315_v38 }
 0x120   :  { %v608_v0 = vand.u32 4294901760, %v4318_v23 }
 0x122   :  { %3001 = vmatmul.mubr.f32.vlgmr.msra.gmra.mrb[2].mxu1 %v608_v0  ;;  %v609_v22 = vsub.f32 %v4318_v23, %v608_v0  ;;  %v4997_v0 = vpack.c.bf16 %v4090_v20, %v4086_v15  ;;  %v4999_v15 = vpack.c.bf16 %v4098_v30, %v4096_v29  ;;  %v5000_v20 = vpack.c.bf16 %v4104_v36, %v4100_v33 }
 0x123   :  { %3591 = vmatpush3.bf16.msra.mxu1 %v4186_v10  ;;  %3035 = vmatprep.mubr.msk.f32.mxu1 %vm4027_vm0, %v4995_v14  ;;  %v5003_v29 = vpack.c.bf16 %v4174_v5, %v4172_v4  ;;  %v5004_v30 = vpack.c.bf16 %v4179_v7, %v4177_v6  ;;  %v5005_v33 = vand.u32 4294901760, %v4264_v17  ;;  %v5006_v36 = vand.u32 4294901760, %v4266_v21  ;;  %v1176_v4 = vld [vmem:[#allocation4 + $0x140] sm:$0xff]  ;;  %v1177_v5 = vld [vmem:[#allocation4 + $0x148] sm:$0xff] }
 0x124   :  { %3592 = vmatprep.subr.bf16.mxu1 %v4996_v43  ;;  %v610_v63 = vand.u32 4294901760, %v609_v22  ;;  %v1217_v10 = vand.u32 4294901760, %v1176_v4 }
 0x126   :  { %2896 = vmatmul.mubr.f32.vlgmr.msra.gmra.mrb[2].mxu0 %v610_v63  ;;  %v4464_v9 = vsub.f32 %v1176_v4, %v1217_v10  ;;  %v1300_v63 = vand.u32 4294901760, %v4289_v52 }
 0x127   :  { %3519 = vmatpush3.bf16.msra.mxu0 %v4192_v18  ;;  %3594 = vmatpush3.bf16.msra.mxu1 %v4194_v19  ;;  %v1220_v18 = vand.u32 4294901760, %v1177_v5 }
 0x128   :  { %3520 = vmatprep.subr.bf16.mxu0 %v4996_v43  ;;  %3595 = vmatprep.subr.bf16.mxu1 %v4996_v43 }
 0x129   :  { %2930 = vmatprep.mubr.msk.f32.mxu0 %vm4027_vm0, %v4995_v14  ;;  %v4450_v19 = vpack.c.bf16 %v1220_v18, %v1217_v10  ;;  %v4466_v11 = vsub.f32 %v1177_v5, %v1220_v18 }
 0x12b   :  { %3522 = vmatpush3.bf16.msra.mxu0 %v4200_v31  ;;  %3597 = vmatpush3.bf16.msra.mxu1 %v4202_v32  ;;  %v1178_v31 = vld [vmem:[#allocation4 + $0x150] sm:$0xff]  ;;  %v1179_v32 = vld [vmem:[#allocation4 + $0x158] sm:$0xff] }
 0x12c   :  { %3523 = vmatprep.subr.bf16.mxu0 %v4996_v43  ;;  %3598 = vmatprep.subr.bf16.mxu1 %v4996_v43 }
 0x12f   :  { %3525 = vmatpush3.bf16.msra.mxu0 %v4208_v46  ;;  %3600 = vmatpush3.bf16.msra.mxu1 %v4210_v48  ;;  %v1223_v46 = vand.u32 4294901760, %v1178_v31  ;;  %v1226_v48 = vand.u32 4294901760, %v1179_v32 }
 0x130   :  { %3526 = vmatprep.subr.bf16.mxu0 %v4996_v43  ;;  %3601 = vmatprep.subr.bf16.mxu1 %v4996_v43 }
 0x131   :  { %v4468_v17 = vsub.f32 %v1178_v31, %v1223_v46  ;;  %v4470_v21 = vsub.f32 %v1179_v32, %v1226_v48  ;;  %v4985_v32 = vand.u32 4294901760, %v4464_v9 }
 0x133   :  { %3528 = vmatpush3.bf16.msra.mxu0 %v4216_v58  ;;  %3603 = vmatpush3.bf16.msra.mxu1 %v4218_v60  ;;  %v4454_v58 = vpack.c.bf16 %v1226_v48, %v1223_v46  ;;  %v1180_v60 = vld [vmem:[#allocation4 + $0x160] sm:$0xff]  ;;  %v4984_v46 = vand.u32 4294901760, %v4466_v11 }
 0x134   :  { %3529 = vmatprep.subr.bf16.mxu0 %v4996_v43  ;;  %3604 = vmatprep.subr.bf16.mxu1 %v4996_v43 }
 0x137   :  { %3531 = vmatpush3.bf16.msra.mxu0 %v4224_v12  ;;  %3606 = vmatpush3.bf16.msra.mxu1 %v4226_v13  ;;  %v1181_v12 = vld [vmem:[#allocation4 + $0x168] sm:$0xff]  ;;  %v1229_v13 = vand.u32 4294901760, %v1180_v60 }
 0x138   :  { %3532 = vmatprep.subr.bf16.mxu0 %v4996_v43  ;;  %3607 = vmatprep.subr.bf16.mxu1 %v4996_v43 }
 0x139   :  { %v4472_v22 = vsub.f32 %v1180_v60, %v1229_v13  ;;  %v1343_v60 = vsub.f32 %v4464_v9, %v4985_v32  ;;  %v1844_v32 = vld [vmem:[#allocation4 + $0x1c8] sm:$0xff] }
 0x13b   :  { %3534 = vmatpush3.bf16.msra.mxu0 %v4232_v24  ;;  %3609 = vmatpush3.bf16.msra.mxu1 %v4234_v27  ;;  %v1232_v24 = vand.u32 4294901760, %v1181_v12 }
 0x13c   :  { %3535 = vmatprep.subr.bf16.mxu0 %v4996_v43  ;;  %3610 = vmatprep.subr.bf16.mxu1 %v4996_v43 }
 0x13d   :  { %v4458_v27 = vpack.c.bf16 %v1232_v24, %v1229_v13  ;;  %v1344_v13 = vand.u32 4294901760, %v1343_v60 }
 0x13f   :  { %3537 = vmatpush3.bf16.msra.mxu0 %v4240_v45  ;;  %3612 = vmatpush3.bf16.msra.mxu1 %v4242_v49  ;;  %v1182_v45 = vld [vmem:[#allocation4 + $0x170] sm:$0xff]  ;;  %v1183_v49 = vld [vmem:[#allocation4 + $0x178] sm:$0xff] }
 0x140   :  { %3538 = vmatprep.subr.bf16.mxu0 %v4996_v43  ;;  %3613 = vmatprep.subr.bf16.mxu1 %v4996_v43  ;;  %v1238_v61 = vand.u32 4294901760, %v1183_v49 }
 0x142   :  { %3036 = vmatmul.mubr.f32.vlgmr.msra.gmra.mrb[2].mxu1 %v4315_v38  ;;  %v4480_v44 = vsub.f32 %v1183_v49, %v1238_v61  ;;  %v4982_v49 = vand.u32 4294901760, %v4470_v21 }
 0x143   :  { %3540 = vmatpush3.bf16.msra.mxu0 %v4246_v57  ;;  %3615 = vmatpush3.bf16.msra.mxu1 %v4116_v39  ;;  %v4998_v39 = vpack.c.bf16 %v4094_v26, %v4092_v25  ;;  %v5001_v25 = vpack.c.bf16 %v4148_v51, %v4146_v50  ;;  %v5002_v26 = vpack.c.bf16 %v4170_v3, %v4168_v2  ;;  %v5010_v50 = vand.u32 4294901760, %v4298_v56 }
 0x144   :  { %3541 = vmatprep.subr.bf16.mxu0 %v4996_v43  ;;  %3616 = vmatprep.subr.bf16.mxu1 %v4996_v43  ;;  %v1235_v57 = vand.u32 4294901760, %v1182_v45  ;;  %v1294_v56 = vsub.f32 %v4282_v37, %v1293_v8 }
 0x145   :  { %3070 = vmatprep.mubr.msk.f32.mxu1 %vm4027_vm0, %v4995_v14 }
 0x146   :  { %2931 = vmatmul.mubr.f32.vlgmr.msra.gmra.mrb[2].mxu0 %v4315_v38 }
 0x147   :  { %3543 = vmatpush3.bf16.msra.mxu0 %v4997_v0  ;;  %3618 = vmatpush3.bf16.msra.mxu1 %v4122_v40  ;;  %v4416_v40 = vpack.c.bf16 %v5006_v36, %v5005_v33  ;;  %v1307_v0 = vand.u32 4294901760, %v4294_v53  ;;  %v4989_v33 = vand.u32 4294901760, %v4305_v16  ;;  %v5011_v36 = vld [vmem:[#allocation8_spill] sm:$0xff] }
 0x148   :  { %3544 = vmatprep.subr.bf16.mxu0 %v4996_v43  ;;  %3619 = vmatprep.subr.bf16.mxu1 %v4996_v43 }
 0x149   :  { %2965 = vmatprep.mubr.msk.f32.mxu0 %vm4027_vm0, %v4995_v14 }
 0x14b   :  { %3546 = vmatpush3.bf16.msra.mxu0 %v4998_v39  ;;  %3621 = vmatpush3.bf16.msra.mxu1 %v4128_v41  ;;  %v5008_v41 = vand.u32 4294901760, %v4272_v34  ;;  %v4478_v34 = vsub.f32 %v1182_v45, %v1235_v57  ;;  %v4983_v45 = vand.u32 4294901760, %v4468_v17 }
 0x14c   :  { %3547 = vmatprep.subr.bf16.mxu0 %v4996_v43  ;;  %3622 = vmatprep.subr.bf16.mxu1 %v4996_v43 }
 0x14f   :  { %3549 = vmatpush3.bf16.msra.mxu0 %v4999_v15  ;;  %3624 = vmatpush3.bf16.msra.mxu1 %v4136_v42  ;;  %v1295_v15 = vand.u32 4294901760, %v1294_v56 }
 0x150   :  { %3550 = vmatprep.subr.bf16.mxu0 %v4996_v43  ;;  %3625 = vmatprep.subr.bf16.mxu1 %v4996_v43 }
 0x153   :  { %3552 = vmatpush3.bf16.msra.mxu0 %v5000_v20  ;;  %3627 = vmatpush3.bf16.msra.mxu1 %v4144_v47  ;;  %v5009_v47 = vand.u32 4294901760, %v4296_v55  ;;  %v1287_v55 = vsub.f32 %v4277_v35, %v1286_v62  ;;  %v1301_v20 = vsub.f32 %v4289_v52, %v1300_v63 }
 0x154   :  { %3553 = vmatprep.subr.bf16.mxu0 %v4996_v43  ;;  %3628 = vmatprep.subr.bf16.mxu1 %v4996_v43 }
 0x155   :  { %v4437_v51 = vpack.c.bf16 %v5010_v50, %v5009_v47  ;;  %v1288_v39 = vand.u32 4294901760, %v1287_v55  ;;  %v1315_v47 = vsub.f32 %v4305_v16, %v4989_v33  ;;  %v1364_v55 = vsub.f32 %v4470_v21, %v4982_v49 }
 0x157   :  { %3555 = vmatpush3.bf16.msra.mxu0 %v5001_v25  ;;  %3630 = vmatpush3.bf16.msra.mxu1 %v4154_v54  ;;  %v1174_v54 = vld [vmem:[#allocation4 + $0x130] sm:$0xff]  ;;  %v1308_v25 = vsub.f32 %v4294_v53, %v1307_v0 }
 0x158   :  { %3556 = vmatprep.subr.bf16.mxu0 %v4996_v43  ;;  %3631 = vmatprep.subr.bf16.mxu1 %v4996_v43 }
 0x15b   :  { %3558 = vmatpush3.bf16.msra.mxu0 %v5002_v26  ;;  %3633 = vmatpush3.bf16.msra.mxu1 %v4160_v59  ;;  %v1175_v59 = vld [vmem:[#allocation4 + $0x138] sm:$0xff]  ;;  %v4498_v26 = vpack.c.bf16 %v1295_v15, %v1288_v39  ;;  %v1365_v39 = vand.u32 4294901760, %v1364_v55  ;;  %v4981_v15 = vand.u32 4294901760, %v4472_v22 }
 0x15c   :  { %3559 = vmatprep.subr.bf16.mxu0 %v4996_v43  ;;  %3634 = vmatprep.subr.bf16.mxu1 %v4996_v43  ;;  %v1214_v2 = vand.u32 4294901760, %v1175_v59 }
 0x15e   :  { %v4447_v7 = vsub.f32 %v1175_v59, %v1214_v2 }
 0x15f   :  { %3561 = vmatpush3.bf16.msra.mxu0 %v5003_v29  ;;  %3636 = vmatpush3.bf16.msra.mxu1 %v4166_v1  ;;  %v1211_v1 = vand.u32 4294901760, %v1174_v54  ;;  %v1302_v29 = vand.u32 4294901760, %v1301_v20 }
 0x160   :  { %3562 = vmatprep.subr.bf16.mxu0 %v4996_v43  ;;  %3781 = vmatprep.subr.bf16.mxu1 %v4996_v43 }
 0x161   :  { %v4442_v3 = vpack.c.bf16 %v1214_v2, %v1211_v1  ;;  %v4445_v6 = vsub.f32 %v1174_v54, %v1211_v1  ;;  %v1316_v54 = vand.u32 4294901760, %v1315_v47  ;;  %v4986_v2 = vand.u32 4294901760, %v4447_v7 }
 0x162   :  { %3071 = vmatmul.mubr.f32.vlgmr.msra.gmra.mrb[2].mxu1 %v4315_v38  ;;  %v5007_v38 = vand.u32 4294901760, %v4270_v28  ;;  %v4476_v28 = vpack.c.bf16 %v1238_v61, %v1235_v57  ;;  %v1357_v61 = vsub.f32 %v4468_v17, %v4983_v45 }
 0x163   :  { %3564 = vmatpush3.bf16.msra.mxu0 %v5004_v30  ;;  %3315 = vmatprep.mubr.msk.f32.mxu1 %vm4027_vm0, %v4995_v14  ;;  %v1309_v30 = vand.u32 4294901760, %v1308_v25  ;;  %v4987_v1 = vand.u32 4294901760, %v4445_v6  ;;  %v1336_v10 = vsub.f32 %v4447_v7, %v4986_v2  ;;  %v3695_v55 = vpack.c.bf16 %v4447_v7, %v4445_v6 }
 0x164   :  { %3637 = vmatprep.subr.bf16.mxu0 %v4996_v43  ;;  %v4427_v42 = vpack.c.bf16 %v5008_v41, %v5007_v38  ;;  %v4988_v38 = vand.u32 4294901760, %v5011_v36  ;;  %v1358_v56 = vand.u32 4294901760, %v1357_v61  ;;  %v3692_v61 = vpack.c.bf16 %v5011_v36, %v4305_v16 }
 0x165   :  { %v4502_v41 = vpack.c.bf16 %v1309_v30, %v1302_v29  ;;  %v1329_v5 = vsub.f32 %v4445_v6, %v4987_v1  ;;  %v1337_v31 = vand.u32 4294901760, %v1336_v10  ;;  %v1371_v29 = vsub.f32 %v4472_v22, %v4981_v15 }
 0x166   :  { %2966 = vmatmul.mubr.f32.vlgmr.msra.gmra.mrb[2].mxu0 %v4318_v23  ;;  %v4474_v23 = vsub.f32 %v1181_v12, %v1232_v24  ;;  %v1322_v50 = vsub.f32 %v5011_v36, %v4988_v38  ;;  %v1350_v12 = vsub.f32 %v4466_v11, %v4984_v46  ;;  %v3677_v25 = vpack.c.bf16 %v1365_v39, %v1358_v56 }
 0x167   :  { %3639 = vmatpush3.bf16.msra.mxu0 %v4416_v40  ;;  %3105 = vmatprep.mubr.msk.f32.mxu0 %vm4027_vm0, %v4995_v14  ;;  %v1330_v18 = vand.u32 4294901760, %v1329_v5  ;;  %v1372_v47 = vand.u32 4294901760, %v1371_v29  ;;  %v3698_v56 = vpack.c.bf16 %v4466_v11, %v4464_v9  ;;  %v3701_v39 = vpack.c.bf16 %v4470_v21, %v4468_v17 }
 0x168   :  { %3640 = vmatprep.subr.bf16.mxu0 %v4996_v43  ;;  %v1323_v59 = vand.u32 4294901760, %v1322_v50  ;;  %v1351_v24 = vand.u32 4294901760, %v1350_v12  ;;  %v4980_v20 = vand.u32 4294901760, %v4474_v23  ;;  %v3704_v29 = vpack.c.bf16 %v4474_v23, %v4472_v22 }
 0x169   :  { %v3671_v48 = vpack.c.bf16 %v1337_v31, %v1330_v18 }
 0x16a   :  { %v3668_v4 = vpack.c.bf16 %v1323_v59, %v1316_v54  ;;  %v3674_v57 = vpack.c.bf16 %v1351_v24, %v1344_v13  ;;  %v1378_v30 = vsub.f32 %v4474_v23, %v4980_v20  ;;  %v4979_v54 = vand.u32 4294901760, %v4478_v34 }
 0x16b   :  { %3642 = vmatpush3.bf16.msra.mxu0 %v4427_v42  ;;  %v4978_v59 = vand.u32 4294901760, %v4480_v44  ;;  %v3686_v13 = vpack.c.bf16 %v4282_v37, %v4277_v35  ;;  %v3689_v24 = vpack.c.bf16 %v4294_v53, %v4289_v52  ;;  %v5012_v35 = vand.u32 4294901760, %v4305_v16 }
 0x16c   :  { %3643 = vmatprep.subr.bf16.mxu0 %v4996_v43  ;;  %v1379_v50 = vand.u32 4294901760, %v1378_v30  ;;  %v1385_v10 = vsub.f32 %v4478_v34, %v4979_v54  ;;  %v3707_v30 = vpack.c.bf16 %v4480_v44, %v4478_v34  ;;  %v5013_v37 = vand.u32 4294901760, %v5011_v36 }
 0x16d   :  { %v1392_v18 = vsub.f32 %v4480_v44, %v4978_v59  ;;  %v5015_v52 = vand.u32 4294901760, %v4447_v7  ;;  %v5018_v16 = vand.u32 4294901760, %v4468_v17  ;;  %v5019_v36 = vand.u32 4294901760, %v4470_v21  ;;  %v1848_v21 = vld [vmem:[#allocation4 + $0x1e8] sm:$0xff] }
 0x16e   :  { %v3680_v5 = vpack.c.bf16 %v1379_v50, %v1372_v47  ;;  %v1386_v31 = vand.u32 4294901760, %v1385_v10  ;;  %v2510_v10 = vld [vmem:[%s4965_s2 + $0x1] ss:$0 sm:$0xff]  ;;  %v5021_v7 = vand.u32 4294901760, %v4474_v23 }
 0x16f   :  { %3645 = vmatpush3.bf16.msra.mxu0 %v4437_v51  ;;  %v1393_v60 = vand.u32 4294901760, %v1392_v18  ;;  %v1849_v23 = vld [vmem:[#allocation4 + $0x1f0] sm:$0xff] }
 0x170   :  { %3646 = vmatprep.subr.bf16.mxu0 %v4996_v43 }
 0x171   :  { %v3683_v12 = vpack.c.bf16 %v1393_v60, %v1386_v31 }
 0x173   :  { %3648 = vmatpush3.bf16.msra.mxu0 %v4442_v3 }
 0x174   :  { %3649 = vmatprep.subr.bf16.mxu0 %v4996_v43 }
 0x177   :  { %3651 = vmatpush3.bf16.msra.mxu0 %v4450_v19 }
 0x178   :  { %3652 = vmatprep.subr.bf16.mxu0 %v4996_v43 }
 0x17b   :  { %3654 = vmatpush3.bf16.msra.mxu0 %v4454_v58 }
 0x17c   :  { %3655 = vmatprep.subr.bf16.mxu0 %v4996_v43 }
 0x17f   :  { %3657 = vmatpush3.bf16.msra.mxu0 %v4458_v27 }
 0x180   :  { %3658 = vmatprep.subr.bf16.mxu0 %v4996_v43 }
 0x183   :  { %3660 = vmatpush3.bf16.msra.mxu0 %v4476_v28 }
 0x184   :  { %3661 = vmatprep.subr.bf16.mxu0 %v4996_v43 }
 0x235   :  { %v1162_v47 = vpop.f32.mrb[2].mxu1 }
 0x236   :  { %v3072_v50 = vpop.f32.mrb[3].mxu1 }
 0x239   :  { %v867_v18 = vpop.f32.mrb[2].mxu0 }
 0x23a   :  { %v3927_v31 = vadd.f32 %v2510_v10, %v867_v18  ;;  %v2967_v60 = vpop.f32.mrb[3].mxu0  ;;  %v1841_v10 = vld [vmem:[#allocation4 + $0x1b0] sm:$0xff]  ;;  %v1842_v18 = vld [vmem:[#allocation4 + $0x1b8] sm:$0xff] }
 0x23c   :  { %v3928_v59 = vadd.f32 %v3927_v31, %v1162_v47  ;;  %v1843_v31 = vld [vmem:[#allocation4 + $0x1c0] sm:$0xff] }
 0x23e   :  { %v1166_v54 = vmax.f32 %v3928_v59, 0.0  ;;  %v1840_v59 = vld [vmem:[#allocation4 + $0x1a8] sm:$0xff] }
 0x23f   :  { %v1875_v47 = vand.u32 4294901760, %v1840_v59 }
 0x240   :  { %v4569_v20 = vand.u32 4294901760, %v1166_v54 }
 0x241   :  { %v4612_v33 = vsub.f32 %v1840_v59, %v1875_v47 }
 0x242   :  { %v4572_v15 = vsub.f32 %v1166_v54, %v4569_v20  ;;  %v1839_v54 = vld [vmem:[#allocation4 + $0x1a0] sm:$0xff] }
 0x244   :  { %v1275_v49 = vand.u32 4294901760, %v4572_v15 }
 0x246   :  { %v1276_v50 = vsub.f32 %v4572_v15, %v1275_v49 }
 0x248   :  { %v1277_v45 = vand.u32 4294901760, %v1276_v50 }
 0x24a   :  { %3106 = vmatmul.mubr.f32.vlgmr.msra.gmra.mrb[4].mxu0 %v1277_v45 }
 0x24b   :  { %3663 = vmatpush3.bf16.msra.mxu0 %v4498_v26  ;;  %3140 = vmatprep.mubr.msk.f32.mxu0 %vm4027_vm0, %v4995_v14  ;;  %v1835_v26 = vld [vmem:[#allocation4 + $0x180] sm:$0xff] }
 0x24c   :  { %3664 = vmatprep.subr.bf16.mxu0 %v4996_v43 }
 0x24f   :  { %3666 = vmatpush3.bf16.msra.mxu0 %v4502_v41  ;;  %v1836_v41 = vld [vmem:[#allocation4 + $0x188] sm:$0xff] }
 0x250   :  { %3667 = vmatprep.subr.bf16.mxu0 %v4996_v43  ;;  %v1863_v45 = vand.u32 4294901760, %v1836_v41 }
 0x252   :  { %v4598_v50 = vsub.f32 %v1836_v41, %v1863_v45  ;;  %v1881_v41 = vand.u32 4294901760, %v1842_v18 }
 0x253   :  { %3669 = vmatpush3.bf16.msra.mxu0 %v3668_v4  ;;  %v1837_v4 = vld [vmem:[#allocation4 + $0x190] sm:$0xff] }
 0x254   :  { %3670 = vmatprep.subr.bf16.mxu0 %v4996_v43 }
 0x257   :  { %3672 = vmatpush3.bf16.msra.mxu0 %v3671_v48  ;;  %v1860_v48 = vand.u32 4294901760, %v1835_v26 }
 0x258   :  { %3673 = vmatprep.subr.bf16.mxu0 %v4996_v43 }
 0x259   :  { %v4594_v60 = vpack.c.bf16 %v1863_v45, %v1860_v48 }
 0x25b   :  { %3675 = vmatpush3.bf16.msra.mxu0 %v3674_v57  ;;  %v1838_v57 = vld [vmem:[#allocation4 + $0x198] sm:$0xff]  ;;  %3783 = vmatpush3.bf16.msra.mxu1 %v4594_v60 }
 0x25c   :  { %3676 = vmatprep.subr.bf16.mxu0 %v4996_v43  ;;  %3784 = vmatprep.subr.bf16.mxu1 %v4996_v43 }
 0x25f   :  { %3678 = vmatpush3.bf16.msra.mxu0 %v3677_v25  ;;  %v1866_v25 = vand.u32 4294901760, %v1837_v4 }
 0x260   :  { %3679 = vmatprep.subr.bf16.mxu0 %v4996_v43 }
 0x261   :  { %v4600_v46 = vsub.f32 %v1837_v4, %v1866_v25  ;;  %v1887_v4 = vand.u32 4294901760, %v1844_v32 }
 0x263   :  { %3681 = vmatpush3.bf16.msra.mxu0 %v3680_v5  ;;  %v1869_v5 = vand.u32 4294901760, %v1838_v57 }
 0x264   :  { %3682 = vmatprep.subr.bf16.mxu0 %v4996_v43 }
 0x265   :  { %v4602_v2 = vpack.c.bf16 %v1869_v5, %v1866_v25  ;;  %v4604_v1 = vsub.f32 %v1838_v57, %v1869_v5  ;;  %v4618_v57 = vsub.f32 %v1842_v18, %v1881_v41 }
 0x267   :  { %3684 = vmatpush3.bf16.msra.mxu0 %v3683_v12  ;;  %v1872_v12 = vand.u32 4294901760, %v1839_v54  ;;  %3786 = vmatpush3.bf16.msra.mxu1 %v4602_v2 }
 0x268   :  { %3685 = vmatprep.subr.bf16.mxu0 %v4996_v43  ;;  %3787 = vmatprep.subr.bf16.mxu1 %v4996_v43 }
 0x269   :  { %v4606_v38 = vsub.f32 %v1839_v54, %v1872_v12  ;;  %v4622_v54 = vsub.f32 %v1844_v32, %v1887_v4 }
 0x26a   :  { %3141 = vmatmul.mubr.f32.vlgmr.msra.gmra.mrb[4].mxu0 %v4569_v20 }
 0x26b   :  { %3687 = vmatpush3.bf16.msra.mxu0 %v3686_v13  ;;  %3175 = vmatprep.mubr.msk.f32.mxu0 %vm4027_vm0, %v4995_v14  ;;  %v4596_v13 = vsub.f32 %v1835_v26, %v1860_v48  ;;  %v1878_v26 = vand.u32 4294901760, %v1841_v10  ;;  %v1884_v48 = vand.u32 4294901760, %v1843_v31 }
 0x26c   :  { %3688 = vmatprep.subr.bf16.mxu0 %v4996_v43 }
 0x26d   :  { %v4616_v45 = vsub.f32 %v1841_v10, %v1878_v26  ;;  %v4620_v25 = vsub.f32 %v1843_v31, %v1884_v48  ;;  %v4636_v32 = vpack.c.bf16 %v1881_v41, %v1878_v26 }
 0x26f   :  { %3690 = vmatpush3.bf16.msra.mxu0 %v3689_v24  ;;  %v4628_v24 = vpack.c.bf16 %v1875_v47, %v1872_v12 }
 0x270   :  { %3691 = vmatprep.subr.bf16.mxu0 %v4996_v43 }
 0x271   :  { %3789 = vmatpush3.bf16.msra.mxu1 %v4628_v24 }
 0x272   :  { %3790 = vmatprep.subr.bf16.mxu1 %v4996_v43 }
 0x273   :  { %3693 = vmatpush3.bf16.msra.mxu0 %v3692_v61  ;;  %v4644_v61 = vpack.c.bf16 %v1887_v4, %v1884_v48 }
 0x274   :  { %3694 = vmatprep.subr.bf16.mxu0 %v4996_v43 }
 0x275   :  { %3792 = vmatpush3.bf16.msra.mxu1 %v4636_v32 }
 0x276   :  { %3793 = vmatprep.subr.bf16.mxu1 %v4996_v43 }
 0x277   :  { %3696 = vmatpush3.bf16.msra.mxu0 %v3695_v55  ;;  %v3734_v55 = vpack.c.bf16 %v1293_v8, %v1286_v62  ;;  %v3740_v62 = vpack.c.bf16 %v5013_v37, %v5012_v35  ;;  %v5014_v8 = vand.u32 4294901760, %v4445_v6  ;;  %v5020_v6 = vand.u32 4294901760, %v4472_v22 }
 0x278   :  { %3697 = vmatprep.subr.bf16.mxu0 %v4996_v43  ;;  %v1899_v22 = vand.u32 4294901760, %v1848_v21 }
 0x279   :  { %3795 = vmatpush3.bf16.msra.mxu1 %v4644_v61  ;;  %v3743_v53 = vpack.c.bf16 %v5015_v52, %v5014_v8  ;;  %v1981_v8 = vand.u32 4294901760, %v4606_v38  ;;  %v1988_v52 = vand.u32 4294901760, %v4612_v33 }
 0x27a   :  { %3796 = vmatprep.subr.bf16.mxu1 %v4996_v43  ;;  %v4768_v31 = vsub.f32 %v1848_v21, %v1899_v22 }
 0x27b   :  { %3699 = vmatpush3.bf16.msra.mxu0 %v3698_v56  ;;  %v3737_v56 = vpack.c.bf16 %v1307_v0, %v1300_v63  ;;  %v5016_v63 = vand.u32 4294901760, %v4464_v9  ;;  %v5017_v0 = vand.u32 4294901760, %v4466_v11  ;;  %v5022_v9 = vand.u32 4294901760, %v4478_v34 }
 0x27c   :  { %3700 = vmatprep.subr.bf16.mxu0 %v4996_v43  ;;  %v5023_v11 = vand.u32 4294901760, %v4480_v44  ;;  %v1902_v34 = vand.u32 4294901760, %v1849_v23 }
 0x27e   :  { %v4771_v26 = vsub.f32 %v1849_v23, %v1902_v34 }
 0x27f   :  { %3702 = vmatpush3.bf16.msra.mxu0 %v3701_v39  ;;  %v3752_v39 = vpack.c.bf16 %v5021_v7, %v5020_v6  ;;  %v1995_v6 = vand.u32 4294901760, %v4616_v45  ;;  %v2002_v7 = vand.u32 4294901760, %v4618_v57 }
 0x280   :  { %3703 = vmatprep.subr.bf16.mxu0 %v4996_v43 }
 0x283   :  { %3705 = vmatpush3.bf16.msra.mxu0 %v3704_v29  ;;  %v3755_v29 = vpack.c.bf16 %v5023_v11, %v5022_v9  ;;  %v1996_v9 = vsub.f32 %v4616_v45, %v1995_v6  ;;  %v2003_v11 = vsub.f32 %v4618_v57, %v2002_v7 }
 0x284   :  { %3706 = vmatprep.subr.bf16.mxu0 %v4996_v43 }
 0x287   :  { %3708 = vmatpush3.bf16.msra.mxu0 %v3707_v30  ;;  %v1960_v30 = vand.u32 4294901760, %v4598_v50 }
 0x288   :  { %3709 = vmatprep.subr.bf16.mxu0 %v4996_v43 }
 0x289   :  { %v1961_v12 = vsub.f32 %v4598_v50, %v1960_v30 }
 0x28a   :  { %3176 = vmatmul.mubr.f32.vlgmr.msra.gmra.mrb[4].mxu0 %v4572_v15  ;;  %v3749_v15 = vpack.c.bf16 %v5019_v36, %v5018_v16 }
 0x28b   :  { %3711 = vmatpush3.bf16.msra.mxu0 %v4416_v40  ;;  %3210 = vmatprep.mubr.msk.f32.mxu0 %vm4027_vm0, %v4995_v14  ;;  %v1962_v4 = vand.u32 4294901760, %v1961_v12 }
 0x28c   :  { %3712 = vmatprep.subr.bf16.mxu0 %v4996_v43 }
 0x28f   :  { %3714 = vmatpush3.bf16.msra.mxu0 %v4427_v42 }
 0x290   :  { %3715 = vmatprep.subr.bf16.mxu0 %v4996_v43 }
 0x293   :  { %3717 = vmatpush3.bf16.msra.mxu0 %v4437_v51 }
 0x294   :  { %3718 = vmatprep.subr.bf16.mxu0 %v4996_v43 }
 0x297   :  { %3720 = vmatpush3.bf16.msra.mxu0 %v4442_v3 }
 0x298   :  { %3721 = vmatprep.subr.bf16.mxu0 %v4996_v43 }
 0x29b   :  { %3723 = vmatpush3.bf16.msra.mxu0 %v4450_v19 }
 0x29c   :  { %3724 = vmatprep.subr.bf16.mxu0 %v4996_v43 }
 0x29f   :  { %3726 = vmatpush3.bf16.msra.mxu0 %v4454_v58 }
 0x2a0   :  { %3727 = vmatprep.subr.bf16.mxu0 %v4996_v43 }
 0x2a3   :  { %3729 = vmatpush3.bf16.msra.mxu0 %v4458_v27 }
 0x2a4   :  { %3730 = vmatprep.subr.bf16.mxu0 %v4996_v43 }
 0x2a7   :  { %3732 = vmatpush3.bf16.msra.mxu0 %v4476_v28 }
 0x2a8   :  { %3733 = vmatprep.subr.bf16.mxu0 %v4996_v43 }
 0x2aa   :  { %3211 = vmatmul.mubr.f32.vlgmr.msra.gmra.mrb[4].mxu0 %v1275_v49  ;;  %v3746_v49 = vpack.c.bf16 %v5017_v0, %v5016_v63  ;;  %v1982_v0 = vsub.f32 %v4606_v38, %v1981_v8 }
 0x2ab   :  { %3735 = vmatpush3.bf16.msra.mxu0 %v3734_v55  ;;  %3245 = vmatprep.mubr.msk.f32.mxu0 %vm4027_vm0, %v4995_v14  ;;  %v1967_v55 = vand.u32 4294901760, %v4600_v46 }
 0x2ac   :  { %3736 = vmatprep.subr.bf16.mxu0 %v4996_v43  ;;  %v1983_v36 = vand.u32 4294901760, %v1982_v0 }
 0x2ad   :  { %v1968_v37 = vsub.f32 %v4600_v46, %v1967_v55 }
 0x2af   :  { %3738 = vmatpush3.bf16.msra.mxu0 %v3737_v56  ;;  %v1974_v56 = vand.u32 4294901760, %v4604_v1 }
 0x2b0   :  { %3739 = vmatprep.subr.bf16.mxu0 %v4996_v43 }
 0x2b3   :  { %3741 = vmatpush3.bf16.msra.mxu0 %v3740_v62  ;;  %v1975_v62 = vsub.f32 %v4604_v1, %v1974_v56 }
 0x2b4   :  { %3742 = vmatprep.subr.bf16.mxu0 %v4996_v43 }
 0x2b5   :  { %v1976_v63 = vand.u32 4294901760, %v1975_v62 }
 0x2b7   :  { %3744 = vmatpush3.bf16.msra.mxu0 %v3743_v53  ;;  %v1969_v53 = vand.u32 4294901760, %v1968_v37  ;;  %v4992_v37 = vand.u32 4294901760, %v4768_v31 }
 0x2b8   :  { %3745 = vmatprep.subr.bf16.mxu0 %v4996_v43 }
 0x2b9   :  { %v3809_v16 = vpack.c.bf16 %v1976_v63, %v1969_v53  ;;  %v2045_v63 = vsub.f32 %v4768_v31, %v4992_v37 }
 0x2bb   :  { %3747 = vmatpush3.bf16.msra.mxu0 %v3746_v49  ;;  %v1989_v49 = vsub.f32 %v4612_v33, %v1988_v52 }
 0x2bc   :  { %3748 = vmatprep.subr.bf16.mxu0 %v4996_v43 }
 0x2bf   :  { %3750 = vmatpush3.bf16.msra.mxu0 %v3749_v15  ;;  %v1990_v15 = vand.u32 4294901760, %v1989_v49  ;;  %v2046_v49 = vand.u32 4294901760, %v2045_v63 }
 0x2c0   :  { %3751 = vmatprep.subr.bf16.mxu0 %v4996_v43 }
 0x2c3   :  { %3753 = vmatpush3.bf16.msra.mxu0 %v3752_v39  ;;  %v3812_v39 = vpack.c.bf16 %v1990_v15, %v1983_v36  ;;  %v4991_v36 = vand.u32 4294901760, %v4771_v26 }
 0x2c4   :  { %3754 = vmatprep.subr.bf16.mxu0 %v4996_v43 }
 0x2c7   :  { %3756 = vmatpush3.bf16.msra.mxu0 %v3755_v29  ;;  %v1997_v29 = vand.u32 4294901760, %v1996_v9 }
 0x2c8   :  { %3757 = vmatprep.subr.bf16.mxu0 %v4996_v43 }
 0x2ca   :  { %3246 = vmatmul.mubr.f32.vlgmr.msra.gmra.mrb[4].mxu0 %v4569_v20 }
 0x2cb   :  { %3759 = vmatpush3.bf16.msra.mxu0 %v4416_v40  ;;  %3280 = vmatprep.mubr.msk.f32.mxu0 %vm4027_vm0, %v4995_v14  ;;  %v1845_v40 = vld [vmem:[#allocation4 + $0x1d0] sm:$0xff] }
 0x2cc   :  { %3760 = vmatprep.subr.bf16.mxu0 %v4996_v43 }
 0x2cf   :  { %3762 = vmatpush3.bf16.msra.mxu0 %v4427_v42  ;;  %v1846_v42 = vld [vmem:[#allocation4 + $0x1d8] sm:$0xff] }
 0x2d0   :  { %3763 = vmatprep.subr.bf16.mxu0 %v4996_v43 }
 0x2d3   :  { %3765 = vmatpush3.bf16.msra.mxu0 %v4437_v51  ;;  %v1890_v51 = vand.u32 4294901760, %v1845_v40 }
 0x2d4   :  { %3766 = vmatprep.subr.bf16.mxu0 %v4996_v43 }
 0x2d5   :  { %v4762_v47 = vsub.f32 %v1845_v40, %v1890_v51  ;;  %v2004_v40 = vand.u32 4294901760, %v2003_v11  ;;  %v2052_v11 = vsub.f32 %v4771_v26, %v4991_v36 }
 0x2d7   :  { %3768 = vmatpush3.bf16.msra.mxu0 %v4442_v3  ;;  %v1893_v3 = vand.u32 4294901760, %v1846_v42  ;;  %v2023_v23 = vand.u32 4294901760, %v4762_v47 }
 0x2d8   :  { %3769 = vmatprep.subr.bf16.mxu0 %v4996_v43 }
 0x2d9   :  { %v4744_v17 = vpack.c.bf16 %v1893_v3, %v1890_v51  ;;  %v4764_v10 = vsub.f32 %v1846_v42, %v1893_v3  ;;  %v2009_v42 = vand.u32 4294901760, %v4620_v25  ;;  %v2016_v51 = vand.u32 4294901760, %v4622_v54 }
 0x2da   :  { %v3815_v3 = vpack.c.bf16 %v2004_v40, %v1997_v29  ;;  %v2053_v40 = vand.u32 4294901760, %v2052_v11 }
 0x2db   :  { %3771 = vmatpush3.bf16.msra.mxu0 %v4450_v19  ;;  %v1847_v19 = vld [vmem:[#allocation4 + $0x1e0] sm:$0xff]  ;;  %3798 = vmatpush3.bf16.msra.mxu1 %v4744_v17  ;;  %v2017_v21 = vsub.f32 %v4622_v54, %v2016_v51 }
 0x2dc   :  { %3772 = vmatprep.subr.bf16.mxu0 %v4996_v43  ;;  %3799 = vmatprep.subr.bf16.mxu1 %v4996_v43 }
 0x2df   :  { %3774 = vmatpush3.bf16.msra.mxu0 %v4454_v58  ;;  %v1896_v58 = vand.u32 4294901760, %v1847_v19 }
 0x2e0   :  { %3775 = vmatprep.subr.bf16.mxu0 %v4996_v43 }
 0x2e1   :  { %v4766_v18 = vsub.f32 %v1847_v19, %v1896_v58  ;;  %v2010_v19 = vsub.f32 %v4620_v25, %v2009_v42 }
 0x2e3   :  { %3777 = vmatpush3.bf16.msra.mxu0 %v4458_v27  ;;  %v4748_v27 = vpack.c.bf16 %v1899_v22, %v1896_v58  ;;  %v2011_v58 = vand.u32 4294901760, %v2010_v19  ;;  %v2018_v22 = vand.u32 4294901760, %v2017_v21 }
 0x2e4   :  { %3778 = vmatprep.subr.bf16.mxu0 %v4996_v43 }
 0x2e5   :  { %3801 = vmatpush3.bf16.msra.mxu1 %v4748_v27 }
 0x2e6   :  { %3802 = vmatprep.subr.bf16.mxu1 %v4996_v43 }
 0x2e7   :  { %3780 = vmatpush3.bf16.msra.mxu0 %v4476_v28  ;;  %v1850_v28 = vld [vmem:[#allocation4 + $0x1f8] sm:$0xff] }
 0x2e8   :  { %v1905_v44 = vand.u32 4294901760, %v1850_v28 }
 0x2ea   :  { %3281 = vmatmul.mubr.f32.vlgmr.msra.gmra.mrb[4].mxu0 %v4569_v20  ;;  %v1953_v20 = vand.u32 4294901760, %v4596_v13  ;;  %v4754_v59 = vpack.c.bf16 %v1905_v44, %v1902_v34  ;;  %v4773_v41 = vsub.f32 %v1850_v28, %v1905_v44  ;;  %v2030_v28 = vand.u32 4294901760, %v4764_v10 }
 0x2eb   :  { %v3818_v34 = vpack.c.bf16 %v2018_v22, %v2011_v58  ;;  %v2024_v44 = vsub.f32 %v4762_v47, %v2023_v23  ;;  %v3830_v58 = vpack.c.bf16 %v4598_v50, %v4596_v13  ;;  %v3833_v22 = vpack.c.bf16 %v4604_v1, %v4600_v46 }
 0x2ec   :  { %v1954_v5 = vsub.f32 %v4596_v13, %v1953_v20  ;;  %3804 = vmatpush3.bf16.msra.mxu1 %v4754_v59  ;;  %v4990_v15 = vand.u32 4294901760, %v4773_v41  ;;  %v3851_v63 = vpack.c.bf16 %v4773_v41, %v4771_v26  ;;  %v3884_v13 = vpack.c.bf16 %v1988_v52, %v1981_v8 }
 0x2ed   :  { %3805 = vmatprep.subr.bf16.mxu1 %v4996_v43  ;;  %v2025_v12 = vand.u32 4294901760, %v2024_v44  ;;  %v3836_v44 = vpack.c.bf16 %v4612_v33, %v4606_v38  ;;  %v3887_v1 = vpack.c.bf16 %v2002_v7, %v1995_v6  ;;  %v3890_v46 = vpack.c.bf16 %v2016_v51, %v2009_v42 }
 0x2ee   :  { %v1955_v48 = vand.u32 4294901760, %v1954_v5  ;;  %v2031_v5 = vsub.f32 %v4764_v10, %v2030_v28  ;;  %v2059_v29 = vsub.f32 %v4773_v41, %v4990_v15  ;;  %v3893_v33 = vpack.c.bf16 %v2030_v28, %v2023_v23 }
 0x2ef   :  { %v5024_v38 = vand.u32 4294901760, %v4766_v18  ;;  %v5025_v50 = vand.u32 4294901760, %v4768_v31 }
 0x2f0   :  { %v4778_v35 = vpack.c.bf16 %v1962_v4, %v1955_v48  ;;  %v2032_v48 = vand.u32 4294901760, %v2031_v5  ;;  %v4993_v4 = vand.u32 4294901760, %v4766_v18  ;;  %v2060_v19 = vand.u32 4294901760, %v2059_v29 }
 0x2f1   :  { %v3839_v5 = vpack.c.bf16 %v4618_v57, %v4616_v45  ;;  %v3896_v45 = vpack.c.bf16 %v5025_v50, %v5024_v38  ;;  %v5026_v57 = vand.u32 4294901760, %v4771_v26 }
 0x2f2   :  { %v3821_v62 = vpack.c.bf16 %v2032_v48, %v2025_v12  ;;  %v2038_v53 = vsub.f32 %v4766_v18, %v4993_v4  ;;  %v3827_v21 = vpack.c.bf16 %v2060_v19, %v2053_v40  ;;  %v3842_v12 = vpack.c.bf16 %v4622_v54, %v4620_v25 }
 0x2f3   :  { %v3845_v48 = vpack.c.bf16 %v4764_v10, %v4762_v47  ;;  %v5027_v25 = vand.u32 4294901760, %v4773_v41 }
 0x2f4   :  { %v2039_v0 = vand.u32 4294901760, %v2038_v53  ;;  %v3848_v53 = vpack.c.bf16 %v4768_v31, %v4766_v18 }
 0x2f5   :  { %v3899_v54 = vpack.c.bf16 %v5027_v25, %v5026_v57 }
 0x2f6   :  { %v3824_v9 = vpack.c.bf16 %v2046_v49, %v2039_v0  ;;  %v2512_v0 = vld [vmem:[%s4965_s2 + $0x2] ss:$0 sm:$0xff] }
 0x3bd   :  { %v1829_v49 = vpop.f32.mrb[4].mxu0 }
 0x3be   :  { %v3929_v11 = vadd.f32 %v2512_v0, %v1829_v49  ;;  %v3282_v29 = vpop.f32.mrb[5].mxu0 }
 0x3c0   :  { %v1833_v40 = vmax.f32 %v3929_v11, 0.0 }
 0x3c2   :  { %v4853_v19 = vand.u32 4294901760, %v1833_v40 }
 0x3c4   :  { %v1941_v15 = vsub.f32 %v1833_v40, %v4853_v19 }
 0x3c6   :  { %v1942_v36 = vand.u32 4294901760, %v1941_v15 }
 0x3c8   :  { %v1943_v37 = vsub.f32 %v1941_v15, %v1942_v36 }
 0x3ca   :  { %v1944_v4 = vand.u32 4294901760, %v1943_v37 }
 0x3cc   :  { %3316 = vmatmul.mubr.f32.vlgmr.msra.gmra.mrb[4].mxu1 %v1944_v4 }
 0x3cd   :  { %3807 = vmatpush3.bf16.msra.mxu1 %v4778_v35  ;;  %3350 = vmatprep.mubr.msk.f32.mxu1 %vm4027_vm0, %v4995_v14  ;;  %v3878_v35 = vpack.c.bf16 %v1960_v30, %v1953_v20 }
 0x3ce   :  { %3808 = vmatprep.subr.bf16.mxu1 %v4996_v43 }
 0x3d1   :  { %3810 = vmatpush3.bf16.msra.mxu1 %v3809_v16  ;;  %v3881_v16 = vpack.c.bf16 %v1974_v56, %v1967_v55 }
 0x3d2   :  { %3811 = vmatprep.subr.bf16.mxu1 %v4996_v43 }
 0x3d5   :  { %3813 = vmatpush3.bf16.msra.mxu1 %v3812_v39 }
 0x3d6   :  { %3814 = vmatprep.subr.bf16.mxu1 %v4996_v43 }
 0x3d9   :  { %3816 = vmatpush3.bf16.msra.mxu1 %v3815_v3 }
 0x3da   :  { %3817 = vmatprep.subr.bf16.mxu1 %v4996_v43 }
 0x3dd   :  { %3819 = vmatpush3.bf16.msra.mxu1 %v3818_v34 }
 0x3de   :  { %3820 = vmatprep.subr.bf16.mxu1 %v4996_v43 }
 0x3e1   :  { %3822 = vmatpush3.bf16.msra.mxu1 %v3821_v62 }
 0x3e2   :  { %3823 = vmatprep.subr.bf16.mxu1 %v4996_v43 }
 0x3e5   :  { %3825 = vmatpush3.bf16.msra.mxu1 %v3824_v9 }
 0x3e6   :  { %3826 = vmatprep.subr.bf16.mxu1 %v4996_v43 }
 0x3e9   :  { %3828 = vmatpush3.bf16.msra.mxu1 %v3827_v21 }
 0x3ea   :  { %3829 = vmatprep.subr.bf16.mxu1 %v4996_v43 }
 0x3ec   :  { %3351 = vmatmul.mubr.f32.vlgmr.msra.gmra.mrb[4].mxu1 %v4853_v19 }
 0x3ed   :  { %3831 = vmatpush3.bf16.msra.mxu1 %v3830_v58  ;;  %3385 = vmatprep.mubr.msk.f32.mxu1 %vm4027_vm0, %v4995_v14 }
 0x3ee   :  { %3832 = vmatprep.subr.bf16.mxu1 %v4996_v43 }
 0x3f1   :  { %3834 = vmatpush3.bf16.msra.mxu1 %v3833_v22 }
 0x3f2   :  { %3835 = vmatprep.subr.bf16.mxu1 %v4996_v43 }
 0x3f5   :  { %3837 = vmatpush3.bf16.msra.mxu1 %v3836_v44 }
 0x3f6   :  { %3838 = vmatprep.subr.bf16.mxu1 %v4996_v43 }
 0x3f9   :  { %3840 = vmatpush3.bf16.msra.mxu1 %v3839_v5 }
 0x3fa   :  { %3841 = vmatprep.subr.bf16.mxu1 %v4996_v43 }
 0x3fd   :  { %3843 = vmatpush3.bf16.msra.mxu1 %v3842_v12 }
 0x3fe   :  { %3844 = vmatprep.subr.bf16.mxu1 %v4996_v43 }
 0x401   :  { %3846 = vmatpush3.bf16.msra.mxu1 %v3845_v48 }
 0x402   :  { %3847 = vmatprep.subr.bf16.mxu1 %v4996_v43 }
 0x405   :  { %3849 = vmatpush3.bf16.msra.mxu1 %v3848_v53 }
 0x406   :  { %3850 = vmatprep.subr.bf16.mxu1 %v4996_v43 }
 0x409   :  { %3852 = vmatpush3.bf16.msra.mxu1 %v3851_v63 }
 0x40a   :  { %3853 = vmatprep.subr.bf16.mxu1 %v4996_v43 }
 0x40c   :  { %3386 = vmatmul.mubr.f32.vlgmr.msra.gmra.mrb[4].mxu1 %v1941_v15 }
 0x40d   :  { %3855 = vmatpush3.bf16.msra.mxu1 %v4594_v60  ;;  %3420 = vmatprep.mubr.msk.f32.mxu1 %vm4027_vm0, %v4995_v14 }
 0x40e   :  { %3856 = vmatprep.subr.bf16.mxu1 %v4996_v43 }
 0x411   :  { %3858 = vmatpush3.bf16.msra.mxu1 %v4602_v2 }
 0x412   :  { %3859 = vmatprep.subr.bf16.mxu1 %v4996_v43 }
 0x415   :  { %3861 = vmatpush3.bf16.msra.mxu1 %v4628_v24 }
 0x416   :  { %3862 = vmatprep.subr.bf16.mxu1 %v4996_v43 }
 0x419   :  { %3864 = vmatpush3.bf16.msra.mxu1 %v4636_v32 }
 0x41a   :  { %3865 = vmatprep.subr.bf16.mxu1 %v4996_v43 }
 0x41d   :  { %3867 = vmatpush3.bf16.msra.mxu1 %v4644_v61 }
 0x41e   :  { %3868 = vmatprep.subr.bf16.mxu1 %v4996_v43 }
 0x421   :  { %3870 = vmatpush3.bf16.msra.mxu1 %v4744_v17 }
 0x422   :  { %3871 = vmatprep.subr.bf16.mxu1 %v4996_v43 }
 0x425   :  { %3873 = vmatpush3.bf16.msra.mxu1 %v4748_v27 }
 0x426   :  { %3874 = vmatprep.subr.bf16.mxu1 %v4996_v43 }
 0x429   :  { %3876 = vmatpush3.bf16.msra.mxu1 %v4754_v59 }
 0x42a   :  { %3877 = vmatprep.subr.bf16.mxu1 %v4996_v43 }
 0x42c   :  { %3421 = vmatmul.mubr.f32.vlgmr.msra.gmra.mrb[4].mxu1 %v1942_v36 }
 0x42d   :  { %3879 = vmatpush3.bf16.msra.mxu1 %v3878_v35  ;;  %3455 = vmatprep.mubr.msk.f32.mxu1 %vm4027_vm0, %v4995_v14 }
 0x42e   :  { %3880 = vmatprep.subr.bf16.mxu1 %v4996_v43 }
 0x431   :  { %3882 = vmatpush3.bf16.msra.mxu1 %v3881_v16 }
 0x432   :  { %3883 = vmatprep.subr.bf16.mxu1 %v4996_v43 }
 0x435   :  { %3885 = vmatpush3.bf16.msra.mxu1 %v3884_v13 }
 0x436   :  { %3886 = vmatprep.subr.bf16.mxu1 %v4996_v43 }
 0x439   :  { %3888 = vmatpush3.bf16.msra.mxu1 %v3887_v1 }
 0x43a   :  { %3889 = vmatprep.subr.bf16.mxu1 %v4996_v43 }
 0x43d   :  { %3891 = vmatpush3.bf16.msra.mxu1 %v3890_v46 }
 0x43e   :  { %3892 = vmatprep.subr.bf16.mxu1 %v4996_v43 }
 0x441   :  { %3894 = vmatpush3.bf16.msra.mxu1 %v3893_v33 }
 0x442   :  { %3895 = vmatprep.subr.bf16.mxu1 %v4996_v43 }
 0x445   :  { %3897 = vmatpush3.bf16.msra.mxu1 %v3896_v45 }
 0x446   :  { %3898 = vmatprep.subr.bf16.mxu1 %v4996_v43 }
 0x449   :  { %3900 = vmatpush3.bf16.msra.mxu1 %v3899_v54 }
 0x44a   :  { %3901 = vmatprep.subr.bf16.mxu1 %v4996_v43 }
 0x44c   :  { %3456 = vmatmul.mubr.f32.vlgmr.msra.gmra.mrb[4].mxu1 %v4853_v19 }
 0x44d   :  { %3903 = vmatpush3.bf16.msra.mxu1 %v4594_v60  ;;  %3490 = vmatprep.mubr.msk.f32.mxu1 %vm4027_vm0, %v4995_v14  ;;  %v2514_v14 = vld [vmem:[%s4965_s2 + $0x3] ss:$0 sm:$0xff] }
 0x44e   :  { %3904 = vmatprep.subr.bf16.mxu1 %v4996_v43 }
 0x451   :  { %3906 = vmatpush3.bf16.msra.mxu1 %v4602_v2 }
 0x452   :  { %3907 = vmatprep.subr.bf16.mxu1 %v4996_v43 }
 0x455   :  { %3909 = vmatpush3.bf16.msra.mxu1 %v4628_v24 }
 0x456   :  { %3910 = vmatprep.subr.bf16.mxu1 %v4996_v43 }
 0x459   :  { %3912 = vmatpush3.bf16.msra.mxu1 %v4636_v32 }
 0x45a   :  { %3913 = vmatprep.subr.bf16.mxu1 %v4996_v43 }
 0x45d   :  { %3915 = vmatpush3.bf16.msra.mxu1 %v4644_v61 }
 0x45e   :  { %3916 = vmatprep.subr.bf16.mxu1 %v4996_v43 }
 0x461   :  { %3918 = vmatpush3.bf16.msra.mxu1 %v4744_v17 }
 0x462   :  { %3919 = vmatprep.subr.bf16.mxu1 %v4996_v43 }
 0x465   :  { %3921 = vmatpush3.bf16.msra.mxu1 %v4748_v27 }
 0x466   :  { %3922 = vmatprep.subr.bf16.mxu1 %v4996_v43 }
 0x469   :  { %3924 = vmatpush3.bf16.msra.mxu1 %v4754_v59 }
 0x46c   :  { %3491 = vmatmul.mubr.f32.vlgmr.msra.gmra.mrb[4].mxu1 %v4853_v19 }
 0x53f   :  { %v2496_v2 = vpop.f32.mrb[4].mxu1 }
 0x540   :  { %v3930_v60 = vadd.f32 %v2514_v14, %v2496_v2  ;;  %v3492_v24 = vpop.f32.mrb[5].mxu1 }
 0x542   :  { %2501 = vst.msk [vmem:[%s4966_s3] sm:$0xff] %vm2500_vm2, %v3930_v60 }
 0x543   :  { %2506 = vsyncpa [#allocation3], 1 }
 0x544   :  { %2507 = vsyncpa [#allocation5], 1 }

</bundles_post_ra>
